<compile_context>
chip_gen: v7x
topology: tpu7x:2x2x1
jax: 0.10.0
libtpu: 0.0.40
codegen_flags: <defaults>
</compile_context>

<pallas_src>
import math
import functools

import jax
import jax.numpy as jnp
from jax.experimental import pallas as pl
from jax.experimental.pallas import tpu as pltpu


def _cdiv(a, b):
    return (a + b - 1) // b


def _round_up(a, b):
    return _cdiv(a, b) * b


# ----------------------------- kernels ------------------------------------ #

def _linear_kernel(x_ref, w_ref, o_ref, *, compute_dtype):
    # x: (tm, K) native dtype, w: (tn, K) native dtype -> o = x @ w.T.
    # Cast inside the kernel so the wrapper never makes an HBM copy of W.
    x = x_ref[...].astype(compute_dtype)
    w = w_ref[...].astype(compute_dtype)
    o_ref[...] = jax.lax.dot_general(
        x, w,
        dimension_numbers=(((1,), (1,)), ((), ())),   # trans-B contraction
        preferred_element_type=jnp.float32,
    ).astype(o_ref.dtype)


def _linear_kernel_acc(x_ref, w_ref, o_ref, acc_ref, *, compute_dtype):
    # Fallback for very large K: grid = (outer, inner, K), K last ("arbitrary").
    @pl.when(pl.program_id(2) == 0)
    def _():
        acc_ref[...] = jnp.zeros_like(acc_ref)

    x = x_ref[...].astype(compute_dtype)
    w = w_ref[...].astype(compute_dtype)
    acc_ref[...] += jax.lax.dot_general(
        x, w,
        dimension_numbers=(((1,), (1,)), ((), ())),
        preferred_element_type=jnp.float32,
    )

    @pl.when(pl.program_id(2) == pl.num_programs(2) - 1)
    def _():
        o_ref[...] = acc_ref[...].astype(o_ref.dtype)


# ----------------------------- wrapper ------------------------------------ #

def _vmem_budget():
    """Generation-aware (budget, vmem_limit) in bytes."""
    try:
        cap = int(pltpu.get_tpu_info().vmem_capacity_bytes)
    except Exception:
        cap = 64 * 1024 * 1024                       # v7x-safe fallback
    limit = min((cap * 3) // 4, 96 * 1024 * 1024)    # ~48 MiB v7x, 96 MiB v5e/v6e
    budget = limit - 2 * 1024 * 1024                 # Mosaic scratch headroom
    return budget, limit


def large_margin_gmm_forward(
    x,
    weight,
    label=None,
    alpha=None,
    *,
    compute_dtype=jnp.bfloat16,
    max_tm=1024,
    max_tn=2048,
    max_tk=4096,
):
    """Pallas forward for LargeMarginGMM: logits = input @ weight.T.

    `label` and `alpha` are accepted to mirror the PyTorch signature but are
    not used by the (empty) reference forward.
    """
    del label, alpha  # unused, same as the PyTorch module

    M, K = x.shape
    N, K2 = weight.shape
    assert K == K2, "in_feature mismatch"

    out_dtype = x.dtype
    xb = jnp.dtype(x.dtype).itemsize
    wb = jnp.dtype(weight.dtype).itemsize
    ob = jnp.dtype(out_dtype).itemsize
    cb = jnp.dtype(compute_dtype).itemsize

    budget, vmem_limit = _vmem_budget()

    # --- K blocking: full K in one block unless K is huge ---------------------
    tk = K if K <= max_tk else max_tk
    nk = _cdiv(K, tk)
    has_acc = nk > 1
    Kp = _round_up(K, tk) if has_acc else K

    # --- M blocking: whole batch when it fits; balanced tiles otherwise ------
    if M <= max_tm:
        tm, n_m = M, 1
    else:
        n_m = _cdiv(M, max_tm)
        tm = _round_up(_cdiv(M, n_m), 8)
        n_m = _cdiv(M, tm)

    # --- total VMEM footprint model (double buffers + in-kernel temporaries) --
    def footprint(tm_, tn_, tk_):
        dbl = 2 * tm_ * tk_ * xb + 2 * tn_ * tk_ * wb + 2 * tm_ * tn_ * ob
        tmp = tm_ * tk_ * cb + tn_ * tk_ * cb + tm_ * tn_ * 4   # casts + f32 result
        acc = tm_ * tn_ * 4 if has_acc else 0
        return dbl + tmp + acc

    # --- N blocking: largest 128-aligned tile under the budget ---------------
    fixed = footprint(tm, 0, tk)
    per_n = max(footprint(tm, 1, tk) - fixed, 1)
    tn = max(128, (max(budget - fixed, 0) // per_n) // 128 * 128)
    tn = min(tn, max_tn)
    if N <= tn:
        tn, n_n = N, 1
    else:
        n_n = _cdiv(N, tn)
        tn = _round_up(_cdiv(N, n_n), 128)    # balanced edge tiles
        n_n = _cdiv(N, tn)

    # --- megacore: guarantee >= 2 blocks along a parallel axis (v7x: 2 TCs) ---
    if n_n * n_m == 1:
        if N >= 256:
            n_n = 2
            tn = _round_up(_cdiv(N, 2), 128)
        elif M >= 16:
            n_m = 2
            tm = _round_up(_cdiv(M, 2), 8)
            n_m = _cdiv(M, tm)

    # --- hard clamp: never exceed the scoped-VMEM limit ----------------------
    while footprint(tm, tn, tk) > budget and tn > 128:
        tn = max(128, _round_up(tn // 2, 128))
        n_n = _cdiv(N, tn)
    while footprint(tm, tn, tk) > budget and tm > 8:
        tm = max(8, _round_up(tm // 2, 8))
        n_m = _cdiv(M, tm)

    # --- K padding only for the multi-K-block fallback (garbage would corrupt
    #     the contraction there; everywhere else ragged blocks are safe). -----
    x_in, w_in = x, weight
    if has_acc and Kp != K:
        x_in = jnp.pad(x, ((0, 0), (0, Kp - K)))
        w_in = jnp.pad(weight, ((0, 0), (0, Kp - K)))

    # --- grid order: stream the larger operand exactly once ------------------
    m_major = (M * K) > (N * K)

    if not has_acc:
        kernel = functools.partial(_linear_kernel, compute_dtype=compute_dtype)
        if m_major:
            grid = (n_m, n_n)
            x_map = lambda i, j: (i, 0)
            w_map = lambda i, j: (j, 0)
            o_map = lambda i, j: (i, j)
        else:
            grid = (n_n, n_m)
            x_map = lambda j, i: (i, 0)
            w_map = lambda j, i: (j, 0)
            o_map = lambda j, i: (i, j)
        in_specs = [pl.BlockSpec((tm, tk), x_map),
                    pl.BlockSpec((tn, tk), w_map)]
        out_spec = pl.BlockSpec((tm, tn), o_map)
        scratch = []
        dim_sem = ("parallel", "parallel")
    else:
        kernel = functools.partial(_linear_kernel_acc, compute_dtype=compute_dtype)
        if m_major:
            grid = (n_m, n_n, nk)
            x_map = lambda i, j, k: (i, k)
            w_map = lambda i, j, k: (j, k)
            o_map = lambda i, j, k: (i, j)
        else:
            grid = (n_n, n_m, nk)
            x_map = lambda j, i, k: (i, k)
            w_map = lambda j, i, k: (j, k)
            o_map = lambda j, i, k: (i, j)
        in_specs = [pl.BlockSpec((tm, tk), x_map),
                    pl.BlockSpec((tn, tk), w_map)]
        out_spec = pl.BlockSpec((tm, tn), o_map)
        scratch = [pltpu.VMEM((tm, tn), jnp.float32)]
        dim_sem = ("parallel", "parallel", "arbitrary")

    out = pl.pallas_call(
        kernel,
        out_shape=jax.ShapeDtypeStruct((M, N), out_dtype),
        grid_spec=pltpu.PrefetchScalarGridSpec(
            num_scalar_prefetch=0,
            grid=grid,
            in_specs=in_specs,
            out_specs=out_spec,
            scratch_shapes=scratch,
        ),
        compiler_params=pltpu.CompilerParams(
            dimension_semantics=dim_sem,
            vmem_limit_bytes=vmem_limit,
        ),
    )(x_in, w_in)

    return out


def xavier_uniform(key, shape, dtype=jnp.float32):
    # nn.init.xavier_uniform_ for a (fan_out, fan_in) weight matrix, gain=1.
    fan_out, fan_in = shape
    bound = math.sqrt(6.0 / (fan_in + fan_out))
    return jax.random.uniform(key, shape, dtype=dtype, minval=-bound, maxval=bound)


# ------------------------------- demo -------------------------------------- #

if __name__ == "__main__":
    in_feature = 128
    out_feature = 1000   # not a multiple of 128: exercises the ragged-N path
    batch = 8
    alpha = 0.01

    key = jax.random.PRNGKey(0)
    k_x, k_w, k_l = jax.random.split(key, 3)

    x = jax.random.normal(k_x, (batch, in_feature), dtype=jnp.float32)
    weight = xavier_uniform(k_w, (out_feature, in_feature))
    label = jax.random.randint(k_l, (batch,), 0, out_feature)  # ignored

    fwd = jax.jit(functools.partial(large_margin_gmm_forward, alpha=alpha))
    out = fwd(x, weight, label)
    out = jax.block_until_ready(out)

    assert out.shape == (batch, out_feature)

    # Reference with the same in-kernel bf16 cast (f32 accumulation), F.linear semantics.
    ref = jnp.dot(
        x.astype(jnp.bfloat16).astype(jnp.float32),
        weight.astype(jnp.bfloat16).astype(jnp.float32).T,
    )
    assert jnp.allclose(out, ref, atol=1e-2, rtol=1e-2), "mismatch vs reference"

    print("KERNEL_OK")
</pallas_src>

<mosaic_0001>
module attributes {stable_mosaic.version = 11 : i64} {
  func.func @_linear_kernel(%arg0: i32, %arg1: i32, %arg2: memref<8x128xf32, #tpu.memory_space<vmem>>, %arg3: memref<512x128xf32, #tpu.memory_space<vmem>>, %arg4: memref<8x512xf32, #tpu.memory_space<vmem>>) attributes {dimension_semantics = [#tpu.dimension_semantics<parallel>, #tpu.dimension_semantics<parallel>], iteration_bounds = array<i64: 2, 1>, scalar_prefetch = 0 : i64, scratch_operands = 0 : i64, tpu.core_type = #tpu.core_type<tc>, window_params = [{transform_indices = @transform_0, window_bounds = array<i64: 8, 128>}, {transform_indices = @transform_1, window_bounds = array<i64: 512, 128>}, {transform_indices = @transform_2, window_bounds = array<i64: 8, 512>}]} {
    %c0 = arith.constant 0 : index
    %c0_0 = arith.constant 0 : index
    %0 = vector.load %arg2[%c0, %c0_0] : memref<8x128xf32, #tpu.memory_space<vmem>>, vector<8x128xf32>
    %1 = arith.truncf %0 : vector<8x128xf32> to vector<8x128xbf16>
    %c0_1 = arith.constant 0 : index
    %c0_2 = arith.constant 0 : index
    %2 = vector.load %arg3[%c0_1, %c0_2] : memref<512x128xf32, #tpu.memory_space<vmem>>, vector<512x128xf32>
    %3 = arith.truncf %2 : vector<512x128xf32> to vector<512x128xbf16>
    %cst = arith.constant dense<0.000000e+00> : vector<8x512xf32>
    %4 = tpu.matmul %1, %3, %cst {dimension_numbers = #tpu.dot_dimension_numbers<[1], [1], [0], [0], [0, 0, 1, 0], [], []>} : vector<8x128xbf16>, vector<512x128xbf16>, vector<8x512xf32> -> vector<8x512xf32>
    %c0_3 = arith.constant 0 : index
    %c0_4 = arith.constant 0 : index
    %5 = vector.load %arg4[%c0_3, %c0_4] : memref<8x512xf32, #tpu.memory_space<vmem>>, vector<8x512xf32>
    tpu.vector_store %arg4[%c0_3, %c0_4], %4 {strides = array<i32>} : memref<8x512xf32, #tpu.memory_space<vmem>>, vector<8x512xf32>,
    return
  }
  func.func @transform_0(%arg0: i32, %arg1: i32) -> (i32, i32) {
    %c0_i32 = arith.constant 0 : i32
    %c0_i32_0 = arith.constant 0 : i32
    return %arg1, %c0_i32 : i32, i32
  }
  func.func @transform_1(%arg0: i32, %arg1: i32) -> (i32, i32) {
    %c0_i32 = arith.constant 0 : i32
    %c0_i32_0 = arith.constant 0 : i32
    return %arg0, %c0_i32 : i32, i32
  }
  func.func @transform_2(%arg0: i32, %arg1: i32) -> (i32, i32) {
    %c0_i32 = arith.constant 0 : i32
    return %arg1, %arg0 : i32, i32
  }
}

</mosaic_0001>

<bundles_post_ra>
// kernel: large_margin_gmm_forward.1
= control target key start
LH: loop header
LB: loop body
LE: loop exit
PB: predicated region body
PF: predicated region fallthrough
CT: control target
= control target key end

     0   :  { %7 = vsyncpa [#allocation3], 0  ;;  %s1083_s0 = inlined_call_operand.hbm [shape: f32[8,128], index: 0, kind: input, shape index: {}]   ;;  %s1084_s1 = inlined_call_operand.hbm [shape: f32[1000,128], index: 1, kind: input, shape index: {}]   ;;  %s1085_s2 = inlined_call_operand.hbm [shape: f32[8,1000], index: 2, kind: output, shape index: {}]  }
   0x1   :  { %8 = vsyncpa [#allocation6], 0 }
   0x2   :  { %10 = vsyncpa [#allocation6 + $0x1], 0 }
   0x3   :  { %11 = vsyncpa [#allocation4], 0 }
   0x4   :  { %13 = vsyncpa [#allocation4 + $0x1], 0  ;;  %s797_s9 = smov 0   ;;  %s799_s10 = smov 0  }
   0x5   :  { %s801_s11 = smov 0   ;;  %s803_s12 = smov 0  }
   0x6   :  { %s805_s13 = smov 0   ;;  %s807_s14 = smov 0  }
   0x7 LB: > { %s505_s15 = sadd.s32 4294967295, %s775_s14   ;;  %s506_s16 = sadd.s32 4294967294, %s775_s14   ;;  %s775_s14 = sphi %s807_s14, %s19_s14   ;;  %s771_s13 = sphi %s805_s13, %s1108_s13   ;;  %s767_s12 = sphi %s803_s12, %s1107_s12   ;;  %s763_s11 = sphi %s801_s11, %s1106_s11   ;;  %s759_s10 = sphi %s799_s10, %s1105_s10   ;;  %s755_s9 = sphi %s797_s9, %s1104_s9  }
   0x8   : > { %s31_s17 = sadd.s32 1, %s771_s13  ;;  %s64_s18 = sadd.s32 1, %s763_s11 }
   0x9   : > { %p33_p0 = scmp.ge.s32.totalorder %s31_s17, 2  ;;  %p71_p1 = scmp.ne.s32.totalorder %s763_s11, %s759_s10 }
   0xa   : > { %p72_p2 = scmp.eq.s32.totalorder %s775_s14, 0  ;;  %p77_p3 = scmp.ne.s32.totalorder %s759_s10, %s755_s9 }
   0xb   : > { %s1110_s17 = smov (%p33_p0, %s31_s17), 0  ;;  %p842_p5 = scmp.eq.s32.totalorder %s505_s15, 0 }
   0xc   : > { %p838_p4 = por %p72_p2, %p71_p1  ;;  %s61_s21 = ssub.s32 %s771_s13, %s1110_s17 }
   0xd   : > { %s1092_s20 = scalar_select %p842_p5, 1, 0 }
   0xe   : > { %s1091_s19 = scalar_select %p838_p4, 1, 0 }
   0xf   : > { %p103_p6 = scmp.eq.s32.totalorder %s505_s15, 1  ;;  %p62_p7 = scmp.eq.s32.totalorder %s61_s21, 0 }
  0x10   : > { %p850_p8 = por %p842_p5, %p77_p3  ;;  %p109_p10 = scmp.eq.s32.totalorder %s506_s16, 1 }
  0x11   : > { %p854_p9 = por %p103_p6, %p71_p1  ;;  %p507_p12 = scmp.ge.s32.totalorder %s775_s14, 1 }
  0x12   : > { %s1093_s22 = scalar_select %p850_p8, 1, 0 }
  0x13   : > { %s1094_s23 = scalar_select %p854_p9, 1, 0 }
  0x14   : > { %s859_s24 = scalar_select %p62_p7, %s763_s11, %s64_s18  }
  0x15   : > { %p861_p11 = por %p109_p10, %p77_p3  ;;  %p116_p13 = scmp.lt.s32.totalorder %s775_s14, 3 }
  0x16   : > { %s777_s27 = smov [#allocation2]   ;;  %s633_s4 = scalar_lea.hbm %s1083_s0, 128 }
  0x17   : > { %s1095_s25 = scalar_select %p861_p11, 1, 0 }
  0x18   : > { %p867_p0 = pnand %p507_p12, %p116_p13  ;;  %s131_s28 = sshll.u32 %s777_s27, 4  ;;  %s132_s28 = int_to_ptr.vmem [resolvable:$true] %s131_s28 }
  0x19   : > { %p634_p3 = scmp.ne.s32.totalorder %s1083_s0, %s633_s4  ;;  %p640_p12 = scmp.lt.u32.totalorder %s633_s4, %s1083_s0 }
  0x1a   : > { %s1096_s26 = scalar_select %p867_p0, 1, 0 }
  0x1b   : > { %p571_p1 = pneg %p867_p0 }
  0x1d   : > { %p875_p2 = pnand %p571_p1, %p842_p5 }
  0x1f   : > { %p635_p6 = pneg %p875_p2 }
  0x21   : > { %p636_p7 = pnand %p635_p6, %p634_p3 }
  0x23   : > { %p637_p10 = pneg %p636_p7 }
  0x25   : > { %p642_p13 = pnand %p640_p12, %p637_p10 }
  0x27   : > { %645 = shalt.err (!%p642_p13)
}
  0x28   : > { %s646_s15 = scalar_lea.vmem %s132_s28, 128  ;;  %p654_p8 = scmp.lt.s32.totalorder %s132_s28, %s132_s28 }
  0x29   : > { %p647_p1 = scmp.ne.s32.totalorder %s132_s28, %s646_s15  ;;  %p655_p5 = scmp.lt.s32.totalorder %s646_s15, %s646_s15 }
  0x2b   : > { %p649_p11 = pnand %p647_p1, %p635_p6  ;;  %p656_p0 = por %p655_p5, %p654_p8 }
  0x2d   : > { %p650_p9 = pneg %p649_p11 }
  0x2f   : > { %p657_p4 = pnand %p656_p0, %p650_p9 }
  0x31   : > { %660 = shalt.err (!%p657_p4)
}
  0x32   : > { %574 = dma.hbm_to_vmem [thread:$0]  (!%p875_p2), %s1083_s0, 128, %s132_s28, [#allocation3]  }
  0x33   : > { %p509_p3 = scmp.ge.s32.totalorder %s775_s14, 2 }
  0x34   : > { %p1098_p7 = scmp.ne.s32.totalorder (!%p509_p3), %s1091_s19, 0 }
  0x35   : > { %138 = sbr.rel (%p509_p3) target bundleno = 95 (0x5f), region = 20 }
  0x3c   : > { %141 = sbr.rel (!%p1098_p7) target bundleno = 95 (0x5f), region = 24  ;;  %s142_s21 = sand.u32 (%p1098_p7), 1, %s763_s11  }
  0x3d   : > { %s511_s27 = sshll.u32 (%p1098_p7), %s771_s13, 6  ;;  %s510_s30 = sshll.u32 (%p1098_p7), %s142_s21, 9 }
  0x3e   : > { %s148_s3 = ssub.s32 (%p1098_p7), 125, %s511_s27  ;;  %s905_s4 = scalar_lea.sflag (%p1098_p7), [#allocation6], %s142_s21 }
  0x3f   : > { %p149_p4 = scmp.lt.s32.totalorder (%p1098_p7), %s148_s3, 64  ;;  %s146_s5 = scalar_lea.vmem (%p1098_p7), [#allocation5], %s510_s30 }
  0x43   : > { %s1112_s3 = smov (!%p149_p4, %s148_s3), 64 }
  0x44   : > { %s902_s29 = sshll.u32 %s1112_s3, 7 }
  0x45   : > { %s153_s28 = ssub.s32 8192, %s902_s29 }
  0x46   : > { %154 = vsyncadd %s905_s4, %s153_s28  ;;  %p513_p5 = scmp.ne.s32.totalorder %s902_s29, 0  ;;  %s526_s19 = sshll.u32 %s771_s13, 13 }
  0x47   : > { %s913_s8 = scalar_lea.hbm %s1084_s1, %s526_s19  ;;  %s159_s15 = sshll.u32 %s146_s5, 4  ;;  %s915_s15 = int_to_ptr.vmem [resolvable:$true] %s159_s15 }
  0x48   : > { %s661_s16 = scalar_lea.hbm %s913_s8, %s902_s29  ;;  %s665_s27 = scalar_lea.hbm %s1084_s1, 16000 }
  0x49   : > { %p662_p8 = scmp.ne.s32.totalorder %s913_s8, %s661_s16  ;;  %p666_p0 = scmp.lt.u32.totalorder %s913_s8, %s1084_s1 }
  0x4a   : > { %p667_p2 = scmp.lt.u32.totalorder %s665_s27, %s661_s16  ;;  %p669_p10 = scmp.lt.u32.totalorder %s661_s16, %s913_s8 }
  0x4b   : > { %p663_p9 = pnand %p662_p8, %p513_p5 }
  0x4c   : > { %p668_p6 = por %p667_p2, %p666_p0 }
  0x4d   : > { %p664_p11 = pneg %p663_p9 }
  0x4e   : > { %p670_p12 = por %p669_p10, %p668_p6 }
  0x50   : > { %p671_p13 = pnand %p670_p12, %p664_p11 }
  0x52   : > { %674 = shalt.err (!%p671_p13)
}
  0x53   : > { %s675_s28 = scalar_lea.vmem %s915_s15, %s902_s29  ;;  %s778_s5 = smov [#allocation5]  }
  0x54   : > { %p676_p1 = scmp.ne.s32.totalorder %s915_s15, %s675_s28  ;;  %s679_s19 = sshll.u32 %s778_s5, 4  ;;  %s680_s19 = int_to_ptr.vmem [resolvable:$false] %s679_s19 }
  0x55   : > { %s681_s6 = scalar_lea.vmem %s680_s19, 16384  ;;  %p682_p8 = scmp.lt.s32.totalorder %s915_s15, %s680_s19 }
  0x56   : > { %p677_p7 = pnand %p676_p1, %p513_p5  ;;  %p683_p9 = scmp.lt.s32.totalorder %s681_s6, %s675_s28 }
  0x58   : > { %p678_p4 = pneg %p677_p7  ;;  %p684_p0 = por %p683_p9, %p682_p8 }
  0x5a   : > { %p685_p2 = pnand %p684_p0, %p678_p4 }
  0x5c   : > { %688 = shalt.err (!%p685_p2)
}
  0x5d   : > { %s779_s7 = smov 128   ;;  %s780_s16 = smov 8  }
  0x5e   : > { %165 = dma.hbm_to_vmem [thread:$0]  (%p513_p5), %s913_s8, %s902_s29, %s915_s15, %s905_s4, %s779_s7, %s779_s7, %s780_s16  }
  0x5f PF: > { %p1099_p11 = scmp.ne.s32.totalorder %s1096_s26, 0 }
  0x60   : > { %p1100_p6 = scmp.ne.s32.totalorder (!%p1099_p11), %s1092_s20, 0 }
  0x61   : > { %171 = sbr.rel (%p1099_p11) target bundleno = 406 (0x196), region = 28 }
  0x68   : > { %742 = dma.done.wait (%p1100_p6), [#allocation3], 128  }
  0x69   : > { %744 = vsyncadd (%p1100_p6), [#allocation3], 4294967168  ;;  %s949_s18 = sand.u32 1, %s759_s10   ;;  %p1101_p5 = scmp.ne.s32.totalorder %s1093_s22, 0 }
  0x6a   : > { %s519_s21 = sshll.u32 %s949_s18, 9  ;;  %s178_s27 = scalar_lea.sflag [#allocation6], %s949_s18 }
  0x6b   : > { %s953_s29 = scalar_lea.vmem [#allocation5], %s519_s21 }
  0x6c   : > { %746 = dma.done.wait (%p1101_p5), %s178_s27, 8192  }
  0x6d   : > { %748 = vsyncadd (%p1101_p5), %s178_s27, 4294959104  ;;  %v227_v0 = vld [vmem:[%s953_s29 + $0x80] sm:$0xff]  ;;  %v228_v1 = vld [vmem:[%s953_s29 + $0x88] sm:$0xff]  ;;  %s520_s20 = sshll.u32 %s949_s18, 5  ;;  %s527_s4 = sshll.u32 %s767_s12, 9 }
  0x6e   : > { %v259_v2 = vld [vmem:[%s953_s29 + $0x180] sm:$0xff]  ;;  %v283_v3 = vpack.c.bf16 %v228_v1, %v227_v0  ;;  %v260_v4 = vld [vmem:[%s953_s29 + $0x188] sm:$0xff]  ;;  %v229_v11 = vld [vmem:[%s953_s29 + $0x90] sm:$0xff]  ;;  %s201_s22 = scalar_lea.vmem [#allocation7], %s520_s20  ;;  %s1036_s30 = scalar_lea.hbm %s1085_s2, %s527_s4 }
  0x6f   : > { %v211_v5 = vld [vmem:[%s953_s29] sm:$0xff]  ;;  %v212_v6 = vld [vmem:[%s953_s29 + $0x8] sm:$0xff]  ;;  %v299_v7 = vpack.c.bf16 %v260_v4, %v259_v2  ;;  %v230_v13 = vld [vmem:[%s953_s29 + $0x98] sm:$0xff]  ;;  %s410_s26 = sshll.u32 %s201_s22, 4  ;;  %s394_s12 = scalar_lea.sflag [#allocation4], %s949_s18  ;;  %s1031_s26 = int_to_ptr.vmem [resolvable:$true] %s410_s26 }
  0x70   : > { %v275_v8 = vpack.c.bf16 %v212_v6, %v211_v5  ;;  %v243_v9 = vld [vmem:[%s953_s29 + $0x100] sm:$0xff]  ;;  %v244_v10 = vld [vmem:[%s953_s29 + $0x108] sm:$0xff]  ;;  %528 = vmatprep.subr.bf16.mxu0 %v283_v3  ;;  %v261_v14 = vld [vmem:[%s953_s29 + $0x190] sm:$0xff]  ;;  %v284_v16 = vpack.c.bf16 %v230_v13, %v229_v11  ;;  %s689_s3 = scalar_lea.vmem %s1031_s26, 512  ;;  %p1102_p12 = scmp.ne.s32.totalorder %s1094_s23, 0 }
  0x71   : > { %v291_v12 = vpack.c.bf16 %v244_v10, %v243_v9  ;;  %v262_v15 = vld [vmem:[%s953_s29 + $0x198] sm:$0xff]  ;;  %546 = vmatprep.subr.bf16.mxu1 %v299_v7  ;;  %v213_v18 = vld [vmem:[%s953_s29 + $0x10] sm:$0xff]  ;;  %v231_v22 = vld [vmem:[%s953_s29 + $0xa0] sm:$0xff]  ;;  %p690_p10 = scmp.ne.s32.totalorder %s1031_s26, %s689_s3  ;;  %s781_s28 = smov [#allocation7]  }
  0x72   : > { %529 = vmatpush3.bf16.xpose.msra.mxu0 %v275_v8  ;;  %v300_v17 = vpack.c.bf16 %v262_v15, %v261_v14  ;;  %v214_v19 = vld [vmem:[%s953_s29 + $0x18] sm:$0xff]  ;;  %v245_v20 = vld [vmem:[%s953_s29 + $0x110] sm:$0xff]  ;;  %v232_v23 = vld [vmem:[%s953_s29 + $0xa8] sm:$0xff]  ;;  %s693_s5 = sshll.u32 %s781_s28, 4  ;;  %s694_s5 = int_to_ptr.vmem [resolvable:$false] %s693_s5 }
  0x73   : > { %547 = vmatpush3.bf16.xpose.msra.mxu1 %v291_v12  ;;  %530 = vmatprep.subr.bf16.mxu0 %v284_v16  ;;  %v246_v21 = vld [vmem:[%s953_s29 + $0x118] sm:$0xff]  ;;  %v263_v24 = vld [vmem:[%s953_s29 + $0x1a0] sm:$0xff]  ;;  %v264_v25 = vld [vmem:[%s953_s29 + $0x1a8] sm:$0xff]  ;;  %v276_v26 = vpack.c.bf16 %v214_v19, %v213_v18  ;;  %v285_v28 = vpack.c.bf16 %v232_v23, %v231_v22  ;;  %p691_p13 = pnand %p690_p10, %p1102_p12  ;;  %s695_s19 = scalar_lea.vmem %s694_s5, 1024 }
  0x74   : > { %548 = vmatprep.subr.bf16.mxu1 %v300_v17  ;;  %v292_v27 = vpack.c.bf16 %v246_v21, %v245_v20  ;;  %v301_v29 = vpack.c.bf16 %v264_v25, %v263_v24  ;;  %v215_v30 = vld [vmem:[%s953_s29 + $0x20] sm:$0xff]  ;;  %v216_v31 = vld [vmem:[%s953_s29 + $0x28] sm:$0xff]  ;;  %v233_v34 = vld [vmem:[%s953_s29 + $0xb0] sm:$0xff]  ;;  %p696_p7 = scmp.lt.s32.totalorder %s1031_s26, %s694_s5  ;;  %p697_p4 = scmp.lt.s32.totalorder %s695_s19, %s689_s3 }
  0x75   : > { %v247_v32 = vld [vmem:[%s953_s29 + $0x120] sm:$0xff]  ;;  %v248_v33 = vld [vmem:[%s953_s29 + $0x128] sm:$0xff]  ;;  %v234_v35 = vld [vmem:[%s953_s29 + $0xb8] sm:$0xff]  ;;  %v277_v38 = vpack.c.bf16 %v216_v31, %v215_v30  ;;  %p692_p1 = pneg %p691_p13 }
  0x76   : > { %v265_v36 = vld [vmem:[%s953_s29 + $0x1b0] sm:$0xff]  ;;  %v266_v37 = vld [vmem:[%s953_s29 + $0x1b8] sm:$0xff]  ;;  %v293_v39 = vpack.c.bf16 %v248_v33, %v247_v32  ;;  %v286_v40 = vpack.c.bf16 %v234_v35, %v233_v34  ;;  %v235_v47 = vld [vmem:[%s953_s29 + $0xc0] sm:$0xff]  ;;  %p698_p8 = por %p697_p4, %p696_p7 }
  0x77   : > { %v302_v41 = vpack.c.bf16 %v266_v37, %v265_v36  ;;  %v217_v42 = vld [vmem:[%s953_s29 + $0x30] sm:$0xff]  ;;  %v218_v43 = vld [vmem:[%s953_s29 + $0x38] sm:$0xff]  ;;  %v236_v48 = vld [vmem:[%s953_s29 + $0xc8] sm:$0xff] }
  0x78   : > { %v249_v44 = vld [vmem:[%s953_s29 + $0x130] sm:$0xff]  ;;  %v209_v45 = vld [vmem:[#allocation2] sm:$0xff]  ;;  %v267_v50 = vld [vmem:[%s953_s29 + $0x1c0] sm:$0xff]  ;;  %v278_v52 = vpack.c.bf16 %v218_v43, %v217_v42  ;;  %v287_v54 = vpack.c.bf16 %v236_v48, %v235_v47  ;;  %p699_p9 = pnand %p698_p8, %p692_p1 }
  0x79   : > { %v250_v46 = vld [vmem:[%s953_s29 + $0x138] sm:$0xff]  ;;  %v993_v49 = vpack.c.bf16 %v209_v45, %v209_v45  ;;  %v268_v51 = vld [vmem:[%s953_s29 + $0x1c8] sm:$0xff]  ;;  %v219_v56 = vld [vmem:[%s953_s29 + $0x40] sm:$0xff] }
  0x7a   : > { %531 = vmatpush3.bf16.xpose.msra.mxu0 %v276_v26  ;;  %v294_v53 = vpack.c.bf16 %v250_v46, %v249_v44  ;;  %v303_v55 = vpack.c.bf16 %v268_v51, %v267_v50  ;;  %v220_v57 = vld [vmem:[%s953_s29 + $0x48] sm:$0xff]  ;;  %v251_v58 = vld [vmem:[%s953_s29 + $0x140] sm:$0xff]  ;;  %v237_v60 = vld [vmem:[%s953_s29 + $0xd0] sm:$0xff] }
  0x7b   : > { %549 = vmatpush3.bf16.xpose.msra.mxu1 %v292_v27  ;;  %532 = vmatprep.subr.bf16.mxu0 %v285_v28  ;;  %v252_v59 = vld [vmem:[%s953_s29 + $0x148] sm:$0xff]  ;;  %v238_v61 = vld [vmem:[%s953_s29 + $0xd8] sm:$0xff]  ;;  %v269_v62 = vld [vmem:[%s953_s29 + $0x1d0] sm:$0xff]  ;;  %v279_v0 = vpack.c.bf16 %v220_v57, %v219_v56 }
  0x7c   : > { %550 = vmatprep.subr.bf16.mxu1 %v301_v29  ;;  %544 = vmatprep.mubr.bf16.mxu0 %v993_v49  ;;  %v270_v63 = vld [vmem:[%s953_s29 + $0x1d8] sm:$0xff]  ;;  %v295_v1 = vpack.c.bf16 %v252_v59, %v251_v58  ;;  %v288_v2 = vpack.c.bf16 %v238_v61, %v237_v60  ;;  %v221_v4 = vld [vmem:[%s953_s29 + $0x50] sm:$0xff]  ;;  %v239_v8 = vld [vmem:[%s953_s29 + $0xe0] sm:$0xff] }
  0x7d   : > { %562 = vmatprep.mubr.bf16.mxu1 %v993_v49  ;;  %v304_v3 = vpack.c.bf16 %v270_v63, %v269_v62  ;;  %v222_v5 = vld [vmem:[%s953_s29 + $0x58] sm:$0xff]  ;;  %v253_v6 = vld [vmem:[%s953_s29 + $0x150] sm:$0xff]  ;;  %v240_v9 = vld [vmem:[%s953_s29 + $0xe8] sm:$0xff] }
  0x7e   : > { %v254_v7 = vld [vmem:[%s953_s29 + $0x158] sm:$0xff]  ;;  %v271_v10 = vld [vmem:[%s953_s29 + $0x1e0] sm:$0xff]  ;;  %v272_v11 = vld [vmem:[%s953_s29 + $0x1e8] sm:$0xff]  ;;  %v280_v12 = vpack.c.bf16 %v222_v5, %v221_v4  ;;  %v289_v14 = vpack.c.bf16 %v240_v9, %v239_v8 }
  0x7f   : > { %v296_v13 = vpack.c.bf16 %v254_v7, %v253_v6  ;;  %v305_v15 = vpack.c.bf16 %v272_v11, %v271_v10  ;;  %v223_v16 = vld [vmem:[%s953_s29 + $0x60] sm:$0xff]  ;;  %v224_v17 = vld [vmem:[%s953_s29 + $0x68] sm:$0xff]  ;;  %v241_v20 = vld [vmem:[%s953_s29 + $0xf0] sm:$0xff] }
  0x80   : > { %v255_v18 = vld [vmem:[%s953_s29 + $0x160] sm:$0xff]  ;;  %v256_v19 = vld [vmem:[%s953_s29 + $0x168] sm:$0xff]  ;;  %v242_v21 = vld [vmem:[%s953_s29 + $0xf8] sm:$0xff]  ;;  %v281_v24 = vpack.c.bf16 %v224_v17, %v223_v16 }
  0x81   : > { %v273_v22 = vld [vmem:[%s953_s29 + $0x1f0] sm:$0xff]  ;;  %v274_v23 = vld [vmem:[%s953_s29 + $0x1f8] sm:$0xff]  ;;  %v297_v25 = vpack.c.bf16 %v256_v19, %v255_v18  ;;  %v290_v26 = vpack.c.bf16 %v242_v21, %v241_v20 }
  0x82   : > { %533 = vmatpush3.bf16.xpose.msra.mxu0 %v277_v38  ;;  %v306_v27 = vpack.c.bf16 %v274_v23, %v273_v22  ;;  %v225_v28 = vld [vmem:[%s953_s29 + $0x70] sm:$0xff]  ;;  %v226_v29 = vld [vmem:[%s953_s29 + $0x78] sm:$0xff] }
  0x83   : > { %551 = vmatpush3.bf16.xpose.msra.mxu1 %v293_v39  ;;  %534 = vmatprep.subr.bf16.mxu0 %v286_v40  ;;  %v257_v30 = vld [vmem:[%s953_s29 + $0x170] sm:$0xff]  ;;  %v258_v31 = vld [vmem:[%s953_s29 + $0x178] sm:$0xff]  ;;  %v282_v32 = vpack.c.bf16 %v226_v29, %v225_v28 }
  0x84   : > { %552 = vmatprep.subr.bf16.mxu1 %v302_v41  ;;  %v298_v33 = vpack.c.bf16 %v258_v31, %v257_v30 }
  0x8a   : > { %535 = vmatpush3.bf16.xpose.msra.mxu0 %v278_v52 }
  0x8b   : > { %553 = vmatpush3.bf16.xpose.msra.mxu1 %v294_v53  ;;  %536 = vmatprep.subr.bf16.mxu0 %v287_v54 }
  0x8c   : > { %554 = vmatprep.subr.bf16.mxu1 %v303_v55 }
  0x92   : > { %537 = vmatpush3.bf16.xpose.msra.mxu0 %v279_v0 }
  0x93   : > { %555 = vmatpush3.bf16.xpose.msra.mxu1 %v295_v1  ;;  %538 = vmatprep.subr.bf16.mxu0 %v288_v2 }
  0x94   : > { %556 = vmatprep.subr.bf16.mxu1 %v304_v3 }
  0x9a   : > { %539 = vmatpush3.bf16.xpose.msra.mxu0 %v280_v12 }
  0x9b   : > { %557 = vmatpush3.bf16.xpose.msra.mxu1 %v296_v13  ;;  %540 = vmatprep.subr.bf16.mxu0 %v289_v14 }
  0x9c   : > { %558 = vmatprep.subr.bf16.mxu1 %v305_v15 }
  0xa2   : > { %541 = vmatpush3.bf16.xpose.msra.mxu0 %v281_v24 }
  0xa3   : > { %559 = vmatpush3.bf16.xpose.msra.mxu1 %v297_v25  ;;  %542 = vmatprep.subr.bf16.mxu0 %v290_v26 }
  0xa4   : > { %560 = vmatprep.subr.bf16.mxu1 %v306_v27 }
  0xaa   : > { %543 = vmatpush3.bf16.xpose.msra.mxu0 %v282_v32 }
  0xab   : > { %561 = vmatpush3.bf16.xpose.msra.mxu1 %v298_v33 }
  0xb1   : > { %545 = vmatmul.mubr.bf16.vlgmr.msra.gmra.mrb[0].mxu0 %v993_v49 }
  0xb2   : > { %563 = vmatmul.mubr.bf16.vlgmr.msra.gmra.mrb[0].mxu1 %v993_v49 }
 0x184   : > { %v341_v34 = vpop.f32.mrb[0].mxu0 }
 0x185   : > { %389 = vst [vmem:[%s201_s22] sm:$0xff] %v341_v34  ;;  %v382_v35 = vpop.f32.mrb[0].mxu1  ;;  %v343_v36 = vpop.f32.mrb[1].mxu0 }
 0x186   : > { %391 = vst [vmem:[%s201_s22 + $0x10] sm:$0xff] %v382_v35  ;;  %390 = vst [vmem:[%s201_s22 + $0x8] sm:$0xff] %v343_v36  ;;  %v384_v37 = vpop.f32.mrb[1].mxu1  ;;  %v345_v38 = vpop.f32.mrb[2].mxu0 }
 0x187   : > { %392 = vst [vmem:[%s201_s22 + $0x18] sm:$0xff] %v384_v37  ;;  %v386_v39 = vpop.f32.mrb[2].mxu1  ;;  %v346_v40 = vpop.f32.mrb[3].mxu0 }
 0x188   : > { %v387_v41 = vpop.f32.mrb[3].mxu1 }
 0x189   : > { %702 = shalt.err (!%p699_p9)
}
 0x18a   : > { %s703_s6 = scalar_lea.hbm %s1036_s30, 512  ;;  %s707_s18 = scalar_lea.hbm %s1085_s2, 1024 }
 0x18b   : > { %p704_p0 = scmp.ne.s32.totalorder %s1036_s30, %s703_s6  ;;  %p708_p6 = scmp.lt.u32.totalorder %s1036_s30, %s1085_s2 }
 0x18c   : > { %p709_p5 = scmp.lt.u32.totalorder %s707_s18, %s703_s6  ;;  %p711_p13 = scmp.lt.u32.totalorder %s703_s6, %s1036_s30 }
 0x18d   : > { %p705_p2 = pnand %p704_p0, %p1102_p12 }
 0x18e   : > { %p710_p10 = por %p709_p5, %p708_p6 }
 0x18f   : > { %p706_p11 = pneg %p705_p2 }
 0x190   : > { %p712_p1 = por %p711_p13, %p710_p10 }
 0x192   : > { %p713_p7 = pnand %p712_p1, %p706_p11 }
 0x194   : > { %716 = shalt.err (!%p713_p7)
}
 0x195   : > { %569 = dma.vmem_to_hbm [thread:$0]  (%p1102_p12), %s1031_s26, 512, %s1036_s30, %s394_s12  }
 0x196 PF: > { %s422_s29 = sand.u32 1, %s755_s9   ;;  %p1103_p4 = scmp.ne.s32.totalorder %s1095_s25, 0 }
 0x197   : > { %s423_s20 = scalar_lea.sflag [#allocation4], %s422_s29 }
 0x198   : > { %p576_p8 = pnand %p509_p3, %p1103_p4 }
 0x19a   : > { %750 = dma.done.wait (!%p576_p8), %s423_s20, 512  }
 0x19b   : > { %752 = vsyncadd (!%p576_p8), %s423_s20, 4294966784  ;;  %s19_s14 = sadd.s32 1, %s775_s14   ;;  %s1104_s9 = smov %s759_s10 }
 0x19c   : > { %p16_p9 = scmp.ge.s32.totalorder %s19_s14, 4   ;;  %s1105_s10 = smov %s763_s11 }
 0x19d   : > { %s1106_s11 = smov %s859_s24  ;;  %s1107_s12 = smov %s771_s13 }
 0x19e   : > { %s1108_s13 = smov %s1110_s17  ;;  %18 = sbr.rel (!%p16_p9) target bundleno = 7 (0x7), region = 79 }
 0x1a5   :  { %428 = vsyncpa [#allocation3], 1 }
 0x1a6   :  { %430 = vsyncpa [#allocation3 + $0x1], 1 }
 0x1a7   :  { %431 = vsyncpa [#allocation6], 1 }
 0x1a8   :  { %433 = vsyncpa [#allocation6 + $0x1], 1 }
 0x1a9   :  { %434 = vsyncpa [#allocation4], 1 }
 0x1aa   :  { %436 = vsyncpa [#allocation4 + $0x1], 1 }

</bundles_post_ra>
